<compile_context>
chip_gen: v5e
topology: v5e:2x2
jax: 0.10.0
libtpu: 0.0.40
codegen_flags: <defaults>
</compile_context>

<pallas_src>
import functools

import jax
import jax.numpy as jnp
import numpy as np
from jax.experimental import pallas as pl
from jax.experimental.pallas import tpu as pltpu

NEG_INF = -1e30  # finite "−inf" so padded lanes never produce inf/nan arithmetic


def _round_up(x, m):
    return (x + m - 1) // m * m


# --------------------------------------------------------------------------- #
# Kernel
# --------------------------------------------------------------------------- #
def make_textcnn_kernel(kmax, tb, seq_len):
    """Fused conv-bank + max-pool + classifier kernel for one batch block."""
    tbl = tb * seq_len

    def kernel(emb_ref, w_ref, mask_ref, cb_ref, wc_ref, bc_ref, out_ref):
        emb = emb_ref[...]                                        # [TB*L, DP] bf16

        # Tap 0: lane-dense MXU matmul, f32 accumulate.
        conv = jnp.dot(emb, w_ref[0], preferred_element_type=jnp.float32)  # [TB*L, NFP]

        # Taps 1..KMAX-1: conv[p] += y_i[p + i].  The roll wraps rows from the
        # top of the block to the bottom, but those rows only feed positions
        # that the mask sets to -1e30 before the max, so they never matter.
        for i in range(1, kmax):
            y = jnp.dot(emb, w_ref[i], preferred_element_type=jnp.float32)
            # np.roll semantics: out[p] = y[(p + i) % tbl]
            conv = conv + pltpu.roll(y, shift=tbl - i, axis=0)

        nfp = conv.shape[-1]
        # Mask invalid positions per window, then AdaptiveMaxPool2d((1,1)).
        conv = conv.reshape(tb, seq_len, nfp) + mask_ref[...]     # [TB, L, NFP]
        feat = jnp.max(conv, axis=1) + cb_ref[...]                # [TB, NFP] (+conv bias)

        # Classifier, fused in-kernel; lane-dense [TB, 128] output.
        logits = jnp.dot(feat, wc_ref[...], preferred_element_type=jnp.float32)
        out_ref[...] = (logits + bc_ref[...]).astype(out_ref.dtype)

    return kernel


# --------------------------------------------------------------------------- #
# Parameter packing (glue)
# --------------------------------------------------------------------------- #
def pack_params(params):
    window_sizes = params["window_sizes"]
    E = params["random_embedding"].shape[1]
    D = 2 * E
    C = params["conv_w"][0].shape[0]
    n = len(window_sizes)
    NF = n * C
    num_classes = params["cls_w"].shape[0]
    KMAX = max(window_sizes)

    DP = _round_up(D, 128)
    NFP = _round_up(NF, 128)
    NCP = _round_up(num_classes, 128)

    # Stack every window's conv weights into KMAX per-tap [DP, NFP] matrices.
    # Column (w*C + c) of tap i holds Conv2d weight [c_out=c, :, i, :] of window
    # w (flattened as ci*E + e), zero for taps i >= k_w and for padded rows/cols.
    w_stack = jnp.zeros((KMAX, DP, NFP), jnp.float32)
    conv_b = jnp.zeros((1, NFP), jnp.float32)
    for w, (k, w_t, b) in enumerate(zip(window_sizes, params["conv_w"],
                                        params["conv_b"])):
        wk = jnp.transpose(w_t, (2, 1, 3, 0)).reshape(k, D, C)    # [k, 2E, C]
        w_stack = w_stack.at[:k, :D, w * C:(w + 1) * C].set(wk)
        conv_b = conv_b.at[0, w * C:(w + 1) * C].set(b)

    cls_w = jnp.zeros((NFP, NCP), jnp.float32)
    cls_w = cls_w.at[:NF, :num_classes].set(params["cls_w"].T)
    cls_b = jnp.zeros((1, NCP), jnp.float32)
    cls_b = cls_b.at[0, :num_classes].set(params["cls_b"])

    dims = dict(D=D, DP=DP, NF=NF, NFP=NFP, NCP=NCP, KMAX=KMAX, C=C,
                num_classes=num_classes, window_sizes=tuple(window_sizes))
    return dict(w_stack=w_stack.astype(jnp.bfloat16), conv_b=conv_b,
                cls_w=cls_w, cls_b=cls_b, dims=dims)


def build_position_mask(seq_len, window_sizes, C, NFP):
    """[L, NFP] additive mask: -1e30 at positions p > L-k for each window's cols."""
    m = np.zeros((seq_len, NFP), np.float32)
    for w, k in enumerate(window_sizes):
        valid = seq_len - k + 1
        m[valid:, w * C:(w + 1) * C] = NEG_INF
    return jnp.asarray(m)


# --------------------------------------------------------------------------- #
# Forward (glue + pallas_call)
# --------------------------------------------------------------------------- #
def textcnn_forward(x_tokens, params, batch_block=8):
    """x_tokens: int32 [B, L] -> logits float32 [B, num_classes]."""
    B, L = x_tokens.shape
    kp = pack_params(params)
    d = kp["dims"]
    DP, NFP, NCP, KMAX = d["DP"], d["NFP"], d["NCP"], d["KMAX"]

    # Embedding lookup (glue): [B, L, 2E] slab, zero-padded to DP lanes, bf16.
    emb = jnp.concatenate([params["random_embedding"][x_tokens],
                           params["glove_embedding"][x_tokens]], axis=-1)
    emb = emb.astype(jnp.bfloat16)
    if DP > d["D"]:
        emb = jnp.pad(emb, ((0, 0), (0, 0), (0, DP - d["D"])))
    emb_flat = emb.reshape(B * L, DP)

    # Batch tile: TB batches per grid step ((TB*L, 128)-aligned blocks).
    if B % batch_block == 0 and (batch_block * L) % 8 == 0:
        TB = batch_block
    else:
        TB = B  # full-array block (always legal)
    grid = (B // TB,)

    mask = build_position_mask(L, d["window_sizes"], d["C"], NFP)
    kernel = make_textcnn_kernel(KMAX, TB, L)

    out = pl.pallas_call(
        kernel,
        out_shape=jax.ShapeDtypeStruct((B, NCP), jnp.float32),
        grid=grid,
        in_specs=[
            pl.BlockSpec((TB * L, DP), lambda b: (b, 0)),         # emb block
            pl.BlockSpec((KMAX, DP, NFP), lambda b: (0, 0, 0)),   # stacked conv W
            pl.BlockSpec((L, NFP), lambda b: (0, 0)),             # position mask
            pl.BlockSpec((1, NFP), lambda b: (0, 0)),             # conv bias
            pl.BlockSpec((NFP, NCP), lambda b: (0, 0)),           # classifier W
            pl.BlockSpec((1, NCP), lambda b: (0, 0)),             # classifier b
        ],
        out_specs=pl.BlockSpec((TB, NCP), lambda b: (b, 0)),
        compiler_params=pltpu.CompilerParams(
            dimension_semantics=("parallel",)),
    )(emb_flat, kp["w_stack"], mask, kp["conv_b"], kp["cls_w"], kp["cls_b"])

    return out[:, :d["num_classes"]]                              # drop lane padding


# --------------------------------------------------------------------------- #
# Parameters / reference
# --------------------------------------------------------------------------- #
def init_params(key, vocab_size=100, embedding_size=32, window_sizes=(3, 4, 5),
                out_channels=2, num_classes=10):
    """Deterministic synthetic parameters matching the nn.Module shapes."""
    n = len(window_sizes)
    keys = jax.random.split(key, 2 * n + 4)
    E, C = embedding_size, out_channels

    random_embedding = 0.1 * jax.random.normal(keys[0], (vocab_size, E), jnp.float32)
    glove_embedding = 0.1 * jax.random.normal(keys[1], (vocab_size, E), jnp.float32)

    conv_w, conv_b = [], []
    for i, k in enumerate(window_sizes):
        # PyTorch Conv2d weight layout: [out_channels, in_channels=2, k, E]
        conv_w.append(0.1 * jax.random.normal(keys[2 + 2 * i], (C, 2, k, E), jnp.float32))
        conv_b.append(0.1 * jax.random.normal(keys[3 + 2 * i], (C,), jnp.float32))

    # PyTorch Linear: weight [num_classes, n*C], bias [num_classes]
    cls_w = 0.1 * jax.random.normal(keys[2 + 2 * n], (num_classes, n * C), jnp.float32)
    cls_b = 0.1 * jax.random.normal(keys[3 + 2 * n], (num_classes,), jnp.float32)

    return {
        "random_embedding": random_embedding,
        "glove_embedding": glove_embedding,
        "window_sizes": tuple(window_sizes),
        "conv_w": conv_w,
        "conv_b": conv_b,
        "cls_w": cls_w,
        "cls_b": cls_b,
    }


def reference_forward(x_tokens, params):
    """Pure-JAX NCHW-conv reference mirroring the PyTorch forward.

    Inputs are rounded through bf16 exactly like the kernel path so the
    comparison isolates the kernel math (both accumulate in f32).
    """
    hi = jax.lax.Precision.HIGHEST
    rand = params["random_embedding"][x_tokens]
    glove = params["glove_embedding"][x_tokens]
    emb = jnp.stack([rand, glove], axis=1)                        # [B, 2, L, E]
    emb = emb.astype(jnp.bfloat16).astype(jnp.float32)
    feats = []
    for k, w_t, b in zip(params["window_sizes"], params["conv_w"], params["conv_b"]):
        w = w_t.astype(jnp.bfloat16).astype(jnp.float32)
        out = jax.lax.conv_general_dilated(
            emb, w, window_strides=(1, 1), padding="VALID",
            dimension_numbers=("NCHW", "OIHW", "NCHW"),
            precision=hi)                                         # [B, C, L-k+1, 1]
        out = out + b.reshape(1, -1, 1, 1)
        feats.append(jnp.max(out, axis=(2, 3)))                   # AdaptiveMaxPool2d((1,1))
    features = jnp.concatenate(feats, axis=1)                     # [B, n*C]
    return jnp.dot(features, params["cls_w"].T, precision=hi) + params["cls_b"][None, :]


# --------------------------------------------------------------------------- #
# Demo
# --------------------------------------------------------------------------- #
if __name__ == "__main__":
    key = jax.random.PRNGKey(0)
    pkey, xkey = jax.random.split(key)

    VOCAB, E, C, NUM_CLASSES = 100, 32, 2, 10
    B, L = 16, 16

    params = init_params(pkey, vocab_size=VOCAB, embedding_size=E,
                         window_sizes=(3, 4, 5), out_channels=C,
                         num_classes=NUM_CLASSES)
    x = jax.random.randint(xkey, (B, L), 0, VOCAB, dtype=jnp.int32)

    logits = textcnn_forward(x, params, batch_block=8)
    jax.block_until_ready(logits)
    assert logits.shape == (B, NUM_CLASSES)

    ref = reference_forward(x, params)
    np.testing.assert_allclose(np.asarray(logits), np.asarray(ref),
                               atol=2e-3, rtol=2e-3)
    print("KERNEL_OK")
</pallas_src>

<mosaic_0001>
module attributes {stable_mosaic.version = 11 : i64} {
  func.func @kernel(%arg0: i32, %arg1: memref<128x128xbf16, #tpu.memory_space<vmem>>, %arg2: memref<5x128x128xbf16, #tpu.memory_space<vmem>>, %arg3: memref<16x128xf32, #tpu.memory_space<vmem>>, %arg4: memref<1x128xf32, #tpu.memory_space<vmem>>, %arg5: memref<128x128xf32, #tpu.memory_space<vmem>>, %arg6: memref<1x128xf32, #tpu.memory_space<vmem>>, %arg7: memref<8x128xf32, #tpu.memory_space<vmem>>) attributes {dimension_semantics = [#tpu.dimension_semantics<parallel>], iteration_bounds = array<i64: 2>, scalar_prefetch = 0 : i64, scratch_operands = 0 : i64, tpu.core_type = #tpu.core_type<tc>, window_params = [{transform_indices = @transform_0, window_bounds = array<i64: 128, 128>}, {pipeline_mode = #tpu.pipeline_mode<synchronous>, transform_indices = @transform_1, window_bounds = array<i64: 5, 128, 128>}, {pipeline_mode = #tpu.pipeline_mode<synchronous>, transform_indices = @transform_2, window_bounds = array<i64: 16, 128>}, {pipeline_mode = #tpu.pipeline_mode<synchronous>, transform_indices = @transform_3, window_bounds = array<i64: 1, 128>}, {pipeline_mode = #tpu.pipeline_mode<synchronous>, transform_indices = @transform_4, window_bounds = array<i64: 128, 128>}, {pipeline_mode = #tpu.pipeline_mode<synchronous>, transform_indices = @transform_5, window_bounds = array<i64: 1, 128>}, {transform_indices = @transform_6, window_bounds = array<i64: 8, 128>}]} {
    %c0 = arith.constant 0 : index
    %c0_0 = arith.constant 0 : index
    %0 = vector.load %arg1[%c0, %c0_0] : memref<128x128xbf16, #tpu.memory_space<vmem>>, vector<128x128xbf16>
    %c0_1 = arith.constant 0 : index
    %c0_2 = arith.constant 0 : index
    %c0_3 = arith.constant 0 : index
    %1 = vector.load %arg2[%c0_1, %c0_2, %c0_3] : memref<5x128x128xbf16, #tpu.memory_space<vmem>>, vector<1x128x128xbf16>
    %2 = vector.shape_cast %1 : vector<1x128x128xbf16> to vector<128x128xbf16>
    %cst = arith.constant dense<0.000000e+00> : vector<128x128xf32>
    %3 = tpu.matmul %0, %2, %cst {dimension_numbers = #tpu.dot_dimension_numbers<[1], [0], [0], [1], [0, 0, 1, 1], [], []>} : vector<128x128xbf16>, vector<128x128xbf16>, vector<128x128xf32> -> vector<128x128xf32>
    %c1 = arith.constant 1 : index
    %c0_4 = arith.constant 0 : index
    %c0_5 = arith.constant 0 : index
    %4 = vector.load %arg2[%c1, %c0_4, %c0_5] : memref<5x128x128xbf16, #tpu.memory_space<vmem>>, vector<1x128x128xbf16>
    %5 = vector.shape_cast %4 : vector<1x128x128xbf16> to vector<128x128xbf16>
    %cst_6 = arith.constant dense<0.000000e+00> : vector<128x128xf32>
    %6 = tpu.matmul %0, %5, %cst_6 {dimension_numbers = #tpu.dot_dimension_numbers<[1], [0], [0], [1], [0, 0, 1, 1], [], []>} : vector<128x128xbf16>, vector<128x128xbf16>, vector<128x128xf32> -> vector<128x128xf32>
    %c127_i32 = arith.constant 127 : i32
    %7 = tpu.dynamic_rotate %6 by %c127_i32 dim 0 : vector<128x128xf32>, i32 -> vector<128x128xf32>
    %8 = arith.addf %3, %7 : vector<128x128xf32>
    %c2 = arith.constant 2 : index
    %c0_7 = arith.constant 0 : index
    %c0_8 = arith.constant 0 : index
    %9 = vector.load %arg2[%c2, %c0_7, %c0_8] : memref<5x128x128xbf16, #tpu.memory_space<vmem>>, vector<1x128x128xbf16>
    %10 = vector.shape_cast %9 : vector<1x128x128xbf16> to vector<128x128xbf16>
    %cst_9 = arith.constant dense<0.000000e+00> : vector<128x128xf32>
    %11 = tpu.matmul %0, %10, %cst_9 {dimension_numbers = #tpu.dot_dimension_numbers<[1], [0], [0], [1], [0, 0, 1, 1], [], []>} : vector<128x128xbf16>, vector<128x128xbf16>, vector<128x128xf32> -> vector<128x128xf32>
    %c126_i32 = arith.constant 126 : i32
    %12 = tpu.dynamic_rotate %11 by %c126_i32 dim 0 : vector<128x128xf32>, i32 -> vector<128x128xf32>
    %13 = arith.addf %8, %12 : vector<128x128xf32>
    %c3 = arith.constant 3 : index
    %c0_10 = arith.constant 0 : index
    %c0_11 = arith.constant 0 : index
    %14 = vector.load %arg2[%c3, %c0_10, %c0_11] : memref<5x128x128xbf16, #tpu.memory_space<vmem>>, vector<1x128x128xbf16>
    %15 = vector.shape_cast %14 : vector<1x128x128xbf16> to vector<128x128xbf16>
    %cst_12 = arith.constant dense<0.000000e+00> : vector<128x128xf32>
    %16 = tpu.matmul %0, %15, %cst_12 {dimension_numbers = #tpu.dot_dimension_numbers<[1], [0], [0], [1], [0, 0, 1, 1], [], []>} : vector<128x128xbf16>, vector<128x128xbf16>, vector<128x128xf32> -> vector<128x128xf32>
    %c125_i32 = arith.constant 125 : i32
    %17 = tpu.dynamic_rotate %16 by %c125_i32 dim 0 : vector<128x128xf32>, i32 -> vector<128x128xf32>
    %18 = arith.addf %13, %17 : vector<128x128xf32>
    %c4 = arith.constant 4 : index
    %c0_13 = arith.constant 0 : index
    %c0_14 = arith.constant 0 : index
    %19 = vector.load %arg2[%c4, %c0_13, %c0_14] : memref<5x128x128xbf16, #tpu.memory_space<vmem>>, vector<1x128x128xbf16>
    %20 = vector.shape_cast %19 : vector<1x128x128xbf16> to vector<128x128xbf16>
    %cst_15 = arith.constant dense<0.000000e+00> : vector<128x128xf32>
    %21 = tpu.matmul %0, %20, %cst_15 {dimension_numbers = #tpu.dot_dimension_numbers<[1], [0], [0], [1], [0, 0, 1, 1], [], []>} : vector<128x128xbf16>, vector<128x128xbf16>, vector<128x128xf32> -> vector<128x128xf32>
    %c124_i32 = arith.constant 124 : i32
    %22 = tpu.dynamic_rotate %21 by %c124_i32 dim 0 : vector<128x128xf32>, i32 -> vector<128x128xf32>
    %23 = arith.addf %18, %22 : vector<128x128xf32>
    %24 = vector.shape_cast %23 : vector<128x128xf32> to vector<8x16x128xf32>
    %c0_16 = arith.constant 0 : index
    %c0_17 = arith.constant 0 : index
    %25 = vector.load %arg3[%c0_16, %c0_17] : memref<16x128xf32, #tpu.memory_space<vmem>>, vector<16x128xf32>
    %26 = vector.shape_cast %25 : vector<16x128xf32> to vector<1x16x128xf32>
    %27 = vector.broadcast %26 : vector<1x16x128xf32> to vector<8x16x128xf32>
    %28 = arith.addf %24, %27 : vector<8x16x128xf32>
    %cst_18 = arith.constant dense<0xFF800000> : vector<8x128xf32>
    %29 = vector.multi_reduction <maximumf>, %28, %cst_18 [1] : vector<8x16x128xf32> to vector<8x128xf32>
    %c0_19 = arith.constant 0 : index
    %c0_20 = arith.constant 0 : index
    %30 = vector.load %arg4[%c0_19, %c0_20] : memref<1x128xf32, #tpu.memory_space<vmem>>, vector<1x128xf32>
    %31 = vector.broadcast %30 : vector<1x128xf32> to vector<8x128xf32>
    %32 = arith.addf %29, %31 : vector<8x128xf32>
    %c0_21 = arith.constant 0 : index
    %c0_22 = arith.constant 0 : index
    %33 = vector.load %arg5[%c0_21, %c0_22] : memref<128x128xf32, #tpu.memory_space<vmem>>, vector<128x128xf32>
    %cst_23 = arith.constant dense<0.000000e+00> : vector<8x128xf32>
    %34 = tpu.matmul %32, %33, %cst_23 {dimension_numbers = #tpu.dot_dimension_numbers<[1], [0], [0], [1], [0, 0, 1, 1], [], []>} : vector<8x128xf32>, vector<128x128xf32>, vector<8x128xf32> -> vector<8x128xf32>
    %c0_24 = arith.constant 0 : index
    %c0_25 = arith.constant 0 : index
    %35 = vector.load %arg6[%c0_24, %c0_25] : memref<1x128xf32, #tpu.memory_space<vmem>>, vector<1x128xf32>
    %36 = vector.broadcast %35 : vector<1x128xf32> to vector<8x128xf32>
    %37 = arith.addf %34, %36 : vector<8x128xf32>
    %c0_26 = arith.constant 0 : index
    %c0_27 = arith.constant 0 : index
    %38 = vector.load %arg7[%c0_26, %c0_27] : memref<8x128xf32, #tpu.memory_space<vmem>>, vector<8x128xf32>
    tpu.vector_store %arg7[%c0_26, %c0_27], %37 {strides = array<i32>} : memref<8x128xf32, #tpu.memory_space<vmem>>, vector<8x128xf32>,
    return
  }
  func.func @transform_0(%arg0: i32) -> (i32, i32) {
    %c0_i32 = arith.constant 0 : i32
    %c0_i32_0 = arith.constant 0 : i32
    return %arg0, %c0_i32 : i32, i32
  }
  func.func @transform_1(%arg0: i32) -> (i32, i32, i32) {
    %c0_i32 = arith.constant 0 : i32
    %c0_i32_0 = arith.constant 0 : i32
    %c0_i32_1 = arith.constant 0 : i32
    %c0_i32_2 = arith.constant 0 : i32
    return %c0_i32, %c0_i32_0, %c0_i32_1 : i32, i32, i32
  }
  func.func @transform_2(%arg0: i32) -> (i32, i32) {
    %c0_i32 = arith.constant 0 : i32
    %c0_i32_0 = arith.constant 0 : i32
    %c0_i32_1 = arith.constant 0 : i32
    return %c0_i32, %c0_i32_0 : i32, i32
  }
  func.func @transform_3(%arg0: i32) -> (i32, i32) {
    %c0_i32 = arith.constant 0 : i32
    %c0_i32_0 = arith.constant 0 : i32
    %c0_i32_1 = arith.constant 0 : i32
    return %c0_i32, %c0_i32_0 : i32, i32
  }
  func.func @transform_4(%arg0: i32) -> (i32, i32) {
    %c0_i32 = arith.constant 0 : i32
    %c0_i32_0 = arith.constant 0 : i32
    %c0_i32_1 = arith.constant 0 : i32
    return %c0_i32, %c0_i32_0 : i32, i32
  }
  func.func @transform_5(%arg0: i32) -> (i32, i32) {
    %c0_i32 = arith.constant 0 : i32
    %c0_i32_0 = arith.constant 0 : i32
    %c0_i32_1 = arith.constant 0 : i32
    return %c0_i32, %c0_i32_0 : i32, i32
  }
  func.func @transform_6(%arg0: i32) -> (i32, i32) {
    %c0_i32 = arith.constant 0 : i32
    %c0_i32_0 = arith.constant 0 : i32
    return %arg0, %c0_i32 : i32, i32
  }
}

</mosaic_0001>

<bundles_post_ra>
// kernel: tpu_custom_call.1
= control target key start
LH: loop header
LB: loop body
LE: loop exit
PB: predicated region body
PF: predicated region fallthrough
CT: control target
= control target key end

     0   :  { %11 = vsyncpa [#allocation3], 0  ;;  %s2533_s0 = inlined_call_operand.hbm [shape: bf16[256,128], index: 0, kind: input, shape index: {}]   ;;  %s2534_s1 = inlined_call_operand.hbm [shape: bf16[5,128,128], index: 1, kind: input, shape index: {}]   ;;  %s2535_s2 = inlined_call_operand.hbm [shape: f32[16,128], index: 2, kind: input, shape index: {}]   ;;  %s2536_s3 = inlined_call_operand.vmem [shape: f32[1,128], index: 3, kind: input, shape index: {}]   ;;  %s2537_s4 = inlined_call_operand.hbm [shape: f32[128,128], index: 4, kind: input, shape index: {}]   ;;  %s2538_s5 = inlined_call_operand.vmem [shape: f32[1,128], index: 5, kind: input, shape index: {}]   ;;  %s2539_s6 = inlined_call_operand.hbm [shape: f32[16,128], index: 6, kind: output, shape index: {}]  }
   0x1   :  { %13 = vsyncpa [#allocation3 + $0x1], 0 }
   0x2   :  { %14 = vsyncpa [#allocation6], 0 }
   0x3   :  { %15 = vsyncpa [#allocation9], 0 }
   0x4   :  { %16 = vsyncpa [#allocation4], 0 }
   0x5   :  { %18 = vsyncpa [#allocation4 + $0x1], 0  ;;  %s2015_s21 = smov 0   ;;  %s2017_s22 = smov 0  }
   0x6   :  { %s2019_s23 = smov 0   ;;  %s2021_s24 = smov 0  }
   0x7 LB: > { %s2036_s25 = sadd.s32 4294967295, %s1971_s24   ;;  %s1410_s26 = sadd.s32 4294967294, %s1971_s24   ;;  %s1971_s24 = sphi %s2021_s24, %s2554_s24   ;;  %s1967_s23 = sphi %s2019_s23, %s2553_s23   ;;  %s1963_s22 = sphi %s2017_s22, %s2552_s22   ;;  %s1959_s21 = sphi %s2015_s21, %s2551_s21  }
   0x8   : > { %p44_p0 = scmp.ne.s32.totalorder %s1963_s22, %s1959_s21  ;;  %p45_p1 = scmp.eq.s32.totalorder %s2036_s25, 0 }
   0x9   : > { %p173_p2 = scmp.eq.s32.totalorder %s2036_s25, 1  ;;  %p179_p3 = scmp.eq.s32.totalorder %s1410_s26, 1 }
   0xa   : > { %p2045_p4 = por %p45_p1, %p44_p0  ;;  %p1411_p5 = scmp.ge.s32.totalorder %s1971_s24, 1 }
   0xb   : > { %p2050_p6 = por %p179_p3, %p44_p0  ;;  %p186_p7 = scmp.lt.s32.totalorder %s1971_s24, 3 }
   0xc   : > { %s197_s7 = sshll.u32 %s2534_s1, 4  ;;  %s1973_s9 = smov [#allocation5]   ;;  %s198_s7 = int_to_ptr.hbm [resolvable:$true] %s197_s7 }
   0xd   : > { %p2058_p8 = pnand %p1411_p5, %p186_p7  ;;  %s199_s10 = sshll.u32 %s1973_s9, 4  ;;  %s200_s10 = int_to_ptr.vmem [resolvable:$true] %s199_s10 }
   0xe   : > { %s211_s14 = sshll.u32 %s2535_s2, 4  ;;  %s2540_s15 = smov 64   ;;  %s212_s14 = int_to_ptr.hbm [resolvable:$true] %s211_s14 }
   0xf   : > { %p1710_p9 = pneg %p2058_p8  ;;  %s2541_s16 = smov 4  }
  0x10   : > { %s1976_s17 = smov [#allocation7]   ;;  %s1977_s19 = smov 128  }
  0x11   : > { %p2066_p10 = pnand %p1710_p9, %p45_p1  ;;  %s213_s18 = sshll.u32 %s1976_s17, 4  ;;  %s214_s18 = int_to_ptr.vmem [resolvable:$true] %s213_s18 }
  0x12   : > { %s1978_s20 = smov 8   ;;  %s228_s30 = sshll.u32 %s2537_s4, 4  ;;  %s229_s30 = int_to_ptr.hbm [resolvable:$true] %s228_s30 }
  0x13   : > { %1713 = dma.hbm_to_vmem [thread:$0]  (!%p2066_p10), %s198_s7, 5120, %s200_s10, [#allocation6], %s2540_s15, %s2540_s15, %s2541_s16  }
  0x14   : > { %1716 = dma.hbm_to_vmem [thread:$0]  (!%p2066_p10), %s212_s14, 256, %s214_s18, [#allocation6], %s1977_s19, %s1977_s19, %s1978_s20  }
  0x15   : > { %s1979_s7 = smov [#allocation8]   ;;  %s2087_s10 = sadd.s32 1, %s1971_s24  }
  0x16   : > { %s230_s9 = sshll.u32 %s1979_s7, 4  ;;  %s28_s12 = ssub.s32 %s1971_s24, %s2087_s10  ;;  %s231_s9 = int_to_ptr.vmem [resolvable:$true] %s230_s9 }
  0x17   : > { %1719 = dma.hbm_to_vmem [thread:$0]  (!%p2066_p10), %s229_s30, 2048, %s231_s9, [#allocation9], %s1977_s19, %s1977_s19, %s1978_s20  }
  0x18   : > { %s31_s13 = sadd.s32 1, %s1967_s23  ;;  %p29_p12 = scmp.eq.s32.totalorder %s28_s12, 0 }
  0x19   : > { %p38_p13 = scmp.ne.s32.totalorder %s1967_s23, %s1963_s22  ;;  %p39_p0 = scmp.eq.s32.totalorder %s1971_s24, 0 }
  0x1a   : > { %s2096_s14 = scalar_select %p29_p12, %s1967_s23, %s31_s13  }
  0x1b   : > { %p2100_p3 = por %p173_p2, %p38_p13  ;;  %p1731_p5 = scmp.lt.s32.totalorder %s1971_s24, 2 }
  0x1c   : > { %s247_s18 = sand.u32 1, %s1967_s23   ;;  %s1621_s26 = sshll.u32 %s1971_s24, 6 }
  0x1d   : > { %p40_p7 = por %p39_p0, %p38_p13  ;;  %s1416_s11 = sshll.u32 %s247_s18, 6 }
  0x1e   : > { %s256_s29 = scalar_lea.hbm %s2533_s0, %s1621_s26  ;;  %s251_s7 = scalar_lea.vmem [#allocation2], %s1416_s11 }
  0x1f   : > { %s257_s30 = sshll.u32 %s256_s29, 4  ;;  %s259_s9 = sshll.u32 %s251_s7, 4  ;;  %s258_s30 = int_to_ptr.hbm [resolvable:$true] %s257_s30  ;;  %s260_s9 = int_to_ptr.vmem [resolvable:$true] %s259_s9 }
  0x20   : > { %p2110_p9 = pnand %p1731_p5, %p40_p7  ;;  %s248_s13 = scalar_lea.sflag [#allocation3], %s247_s18 }
  0x21   : > { %s1867_s15 = sshra.s32 %s258_s30, 4  ;;  %s1874_s11 = scalar_lea.hbm %s2533_s0, 128  ;;  %s1868_s15 = int_to_ptr.hbm [resolvable:$true] %s1867_s15 }
  0x22   : > { %s1869_s16 = scalar_lea.hbm %s1868_s15, 64  ;;  %p1871_p10 = pneg %p2110_p9 }
  0x23   : > { %p1870_p2 = scmp.ne.s32.totalorder %s1868_s15, %s1869_s16  ;;  %p1875_p0 = scmp.lt.s32.totalorder %s1868_s15, %s2533_s0 }
  0x24   : > { %p1876_p5 = scmp.lt.s32.totalorder %s1874_s11, %s1869_s16 }
  0x25   : > { %p1872_p12 = pnand %p1871_p10, %p1870_p2 }
  0x26   : > { %p1877_p7 = por %p1876_p5, %p1875_p0 }
  0x27   : > { %p1873_p13 = pneg %p1872_p12 }
  0x29   : > { %p1878_p11 = pnand %p1877_p7, %p1873_p13 }
  0x2b   : > { %1881 = shalt.err (!%p1878_p11)
}
  0x2c   : > { %s2548_s18 = smov 4   ;;  %s2549_s7 = smov 64  }
  0x2d   : > { %1723 = dma.hbm_to_vmem [thread:$0]  (!%p2110_p9), %s258_s30, 1024, %s260_s9, %s248_s13, %s2549_s7, %s2549_s7, %s2548_s18  }
  0x2e   : > { %271 = sbr.rel (%p2058_p8) target bundleno = 550 (0x226), region = 44  ;;  %s2130_s26 = sand.u32 (!%p2058_p8), 1, %s1963_s22  }
  0x2f   : > { %s1420_s15 = sshll.u32 (!%p2058_p8), %s2130_s26, 6  ;;  %s274_s16 = scalar_lea.sflag (!%p2058_p8), [#allocation3], %s2130_s26 }
  0x30   : > { %s2134_s19 = scalar_lea.vmem (!%p2058_p8), [#allocation2], %s1420_s15 }
  0x33   : > { %1942 = dma.done.wait (%p2045_p4), %s274_s16, 1024  }
  0x34   : > { %1944 = vsyncadd (%p2045_p4), %s274_s16, 4294966272 }
  0x35   : > { %1946 = dma.done.wait (%p45_p1), [#allocation6], 5376  }
  0x36   : > { %1948 = vsyncadd (%p45_p1), [#allocation6], 4294961920 }
  0x37   : > { %1950 = dma.done.wait (%p45_p1), [#allocation9], 2048  }
  0x38   : > { %1952 = vsyncadd (%p45_p1), [#allocation9], 4294965248  ;;  %v1645_v0 = vld [vmem:[#allocation5 + $0x78] sm:$0xff]  ;;  %v1644_v1 = vld [vmem:[#allocation5 + $0x70] sm:$0xff]  ;;  %v533_v50 = vlaneseq  ;;  %vm1253_vm4 = vcmask 1041409   ;;  %vm1256_vm5 = vcmask 1042434  }
  0x39   : > { %468 = vmatpush.bf16.msra.mxu0 %v1645_v0  ;;  %1670 = vmatpush.bf16.msra.mxu1 %v1645_v0  ;;  %v1643_v2 = vld [vmem:[#allocation5 + $0x68] sm:$0xff]  ;;  %v1642_v3 = vld [vmem:[#allocation5 + $0x60] sm:$0xff]  ;;  %v1641_v4 = vld [vmem:[#allocation5 + $0x58] sm:$0xff]  ;;  %vm1259_vm6 = vcmask 1043459   ;;  %vm1262_vm7 = vcmask 1044484   ;;  %vm1265_vm8 = vcmask 1045509  }
  0x3a   : > { %1671 = vmatpush.bf16.msra.mxu2 %v1645_v0  ;;  %1672 = vmatpush.bf16.msra.mxu3 %v1645_v0  ;;  %v1640_v5 = vld [vmem:[#allocation5 + $0x50] sm:$0xff]  ;;  %v1639_v6 = vld [vmem:[#allocation5 + $0x48] sm:$0xff]  ;;  %v1638_v7 = vld [vmem:[#allocation5 + $0x40] sm:$0xff]  ;;  %v2195_v51 = vshrl.u32 %v533_v50, 7  ;;  %vm1268_vm9 = vcmask 1046534   ;;  %vm1271_vm10 = vcmask 1047559  }
  0x3b   : > { %v1637_v8 = vld [vmem:[#allocation5 + $0x38] sm:$0xff]  ;;  %v2149_v10 = vld [vmem:[%s2134_s19] sm:$0xff]  ;;  %v2155_v13 = vld [vmem:[%s2134_s19 + $0x28] sm:$0xff]  ;;  %s1424_s30 = sshll.u32 %s2130_s26, 3  ;;  %s1618_s9 = sshll.u32 %s2036_s25, 3 }
  0x3c   : > { %v1661_v9 = vld [vmem:[#allocation5 + $0xf8] sm:$0xff]  ;;  %v2158_v15 = vld [vmem:[%s2134_s19 + $0x10] sm:$0xff]  ;;  %v1635_v20 = vld [vmem:[#allocation5 + $0x28] sm:$0xff]  ;;  %vm535_vm0 = vcmp.lt.s32.totalorder %v2195_v51, 7  ;;  %vm1105_vm1 = vcmp.lt.s32.totalorder %v2195_v51, 4  ;;  %vm779_vm2 = vcmp.lt.s32.totalorder %v2195_v51, 6  ;;  %s1306_s11 = scalar_lea.hbm %s2539_s6, %s1618_s9 }
  0x3d   : > { %469 = vmatpush.bf16.msra.mxu0 %v1644_v1  ;;  %1673 = vmatpush.bf16.msra.mxu1 %v1644_v1  ;;  %v1653_v11 = vld [vmem:[#allocation5 + $0xb8] sm:$0xff]  ;;  %v1636_v16 = vld [vmem:[#allocation5 + $0x30] sm:$0xff]  ;;  %v1659_v21 = vld [vmem:[#allocation5 + $0xe8] sm:$0xff]  ;;  %vm942_vm3 = vcmp.lt.s32.totalorder %v2195_v51, 5  ;;  %s321_s18 = scalar_lea.vmem [#allocation10], %s1424_s30  ;;  %s1310_s15 = sshll.u32 %s1306_s11, 4  ;;  %s1311_s15 = int_to_ptr.hbm [resolvable:$true] %s1310_s15 }
  0x3e   : > { %1674 = vmatpush.bf16.msra.mxu2 %v1644_v1  ;;  %1675 = vmatpush.bf16.msra.mxu3 %v1644_v1  ;;  %v2152_v12 = vld [vmem:[%s2134_s19 + $0x18] sm:$0xff]  ;;  %v1660_v17 = vld [vmem:[#allocation5 + $0xf0] sm:$0xff]  ;;  %v1651_v22 = vld [vmem:[#allocation5 + $0xa8] sm:$0xff]  ;;  %s1308_s7 = sshll.u32 %s321_s18, 4  ;;  %s1296_s16 = scalar_lea.sflag [#allocation4], %s2130_s26  ;;  %s1309_s7 = int_to_ptr.vmem [resolvable:$true] %s1308_s7 }
  0x3f   : > { %v1669_v14 = vld [vmem:[#allocation5 + $0x138] sm:$0xff]  ;;  %v1652_v18 = vld [vmem:[#allocation5 + $0xb0] sm:$0xff]  ;;  %v1667_v23 = vld [vmem:[#allocation5 + $0x128] sm:$0xff]  ;;  %s1917_s9 = scalar_lea.hbm %s2539_s6, 16 }
  0x40   : > { %v1668_v19 = vld [vmem:[#allocation5 + $0x130] sm:$0xff]  ;;  %v1634_v24 = vld [vmem:[#allocation5 + $0x20] sm:$0xff]  ;;  %v1633_v28 = vld [vmem:[#allocation5 + $0x18] sm:$0xff] }
  0x41   : > { %470 = vmatpush.bf16.msra.mxu0 %v1643_v2  ;;  %1676 = vmatpush.bf16.msra.mxu1 %v1643_v2  ;;  %v1658_v25 = vld [vmem:[#allocation5 + $0xe0] sm:$0xff]  ;;  %v1657_v29 = vld [vmem:[#allocation5 + $0xd8] sm:$0xff]  ;;  %v1623_v30 = vld [vmem:[%s2134_s19 + $0x8] sm:$0xff] }
  0x42   : > { %1677 = vmatpush.bf16.msra.mxu2 %v1643_v2  ;;  %1678 = vmatpush.bf16.msra.mxu3 %v1643_v2  ;;  %v1650_v26 = vld [vmem:[#allocation5 + $0xa0] sm:$0xff]  ;;  %v1649_v31 = vld [vmem:[#allocation5 + $0x98] sm:$0xff]  ;;  %v2167_v33 = vld [vmem:[%s2134_s19 + $0x30] sm:$0xff] }
  0x43   : > { %v1666_v27 = vld [vmem:[#allocation5 + $0x120] sm:$0xff]  ;;  %v1665_v34 = vld [vmem:[#allocation5 + $0x118] sm:$0xff]  ;;  %v1632_v35 = vld [vmem:[#allocation5 + $0x10] sm:$0xff] }
  0x44   : > { %v1626_v32 = vld [vmem:[%s2134_s19 + $0x20] sm:$0xff]  ;;  %v1656_v36 = vld [vmem:[#allocation5 + $0xd0] sm:$0xff]  ;;  %v1631_v39 = vld [vmem:[#allocation5 + $0x8] sm:$0xff] }
  0x45   : > { %471 = vmatpush.bf16.msra.mxu0 %v1642_v3  ;;  %1679 = vmatpush.bf16.msra.mxu1 %v1642_v3  ;;  %v1648_v37 = vld [vmem:[#allocation5 + $0x90] sm:$0xff]  ;;  %v1655_v40 = vld [vmem:[#allocation5 + $0xc8] sm:$0xff]  ;;  %v1630_v43 = vld [vmem:[#allocation5] sm:$0xff] }
  0x46   : > { %1680 = vmatpush.bf16.msra.mxu2 %v1642_v3  ;;  %1681 = vmatpush.bf16.msra.mxu3 %v1642_v3  ;;  %v1664_v38 = vld [vmem:[#allocation5 + $0x110] sm:$0xff]  ;;  %v1647_v41 = vld [vmem:[#allocation5 + $0x88] sm:$0xff]  ;;  %v1654_v44 = vld [vmem:[#allocation5 + $0xc0] sm:$0xff] }
  0x47   : > { %v1663_v42 = vld [vmem:[#allocation5 + $0x108] sm:$0xff]  ;;  %v1646_v45 = vld [vmem:[#allocation5 + $0x80] sm:$0xff]  ;;  %v2171_v47 = vld [vmem:[%s2134_s19 + $0x38] sm:$0xff]  ;;  %s1911_s19 = sshra.s32 %s1311_s15, 4  ;;  %s1912_s19 = int_to_ptr.hbm [resolvable:$true] %s1911_s19 }
  0x48   : > { %v1662_v46 = vld [vmem:[#allocation5 + $0x100] sm:$0xff]  ;;  %s1913_s25 = scalar_lea.hbm %s1912_s19, 8  ;;  %p1918_p11 = scmp.lt.s32.totalorder %s1912_s19, %s2539_s6 }
  0x49   : > { %472 = vmatpush.bf16.msra.mxu0 %v1641_v4  ;;  %1682 = vmatpush.bf16.msra.mxu1 %v1641_v4  ;;  %p1914_p1 = scmp.ne.s32.totalorder %s1912_s19, %s1913_s25  ;;  %p1919_p9 = scmp.lt.s32.totalorder %s1917_s9, %s1913_s25 }
  0x4a   : > { %1683 = vmatpush.bf16.msra.mxu2 %v1641_v4  ;;  %1684 = vmatpush.bf16.msra.mxu3 %v1641_v4 }
  0x4b   : > { %p1915_p4 = pnand %p1914_p1, %p2100_p3  ;;  %p1920_p2 = por %p1919_p9, %p1918_p11 }
  0x4d   : > { %473 = vmatpush.bf16.msra.mxu0 %v1640_v5  ;;  %1685 = vmatpush.bf16.msra.mxu1 %v1640_v5  ;;  %p1916_p8 = pneg %p1915_p4 }
  0x4e   : > { %1686 = vmatpush.bf16.msra.mxu2 %v1640_v5  ;;  %1687 = vmatpush.bf16.msra.mxu3 %v1640_v5 }
  0x4f   : > { %p1921_p10 = pnand %p1920_p2, %p1916_p8 }
  0x51   : > { %474 = vmatpush.bf16.msra.mxu0 %v1639_v6  ;;  %1688 = vmatpush.bf16.msra.mxu1 %v1639_v6 }
  0x52   : > { %1689 = vmatpush.bf16.msra.mxu2 %v1639_v6  ;;  %1690 = vmatpush.bf16.msra.mxu3 %v1639_v6 }
  0x55   : > { %475 = vmatpush.bf16.msra.mxu0 %v1638_v7  ;;  %1691 = vmatpush.bf16.msra.mxu1 %v1638_v7 }
  0x56   : > { %1692 = vmatpush.bf16.msra.mxu2 %v1638_v7  ;;  %1693 = vmatpush.bf16.msra.mxu3 %v1638_v7 }
  0x58   : > { %476 = vmatmul.bf16.vlgmr.msra.gmra.mxu0 %v2149_v10  ;;  %486 = vmatmul.bf16.vlgmr.msra.gmra.mxu1 %v2158_v15 }
  0x59   : > { %600 = vmatpush.bf16.msrb.mxu1 %v1637_v8  ;;  %491 = vmatmul.bf16.vlgmr.msra.gmra.mxu2 %v2152_v12 }
  0x5a   : > { %877 = vmatpush.bf16.msrb.mxu3 %v1661_v9  ;;  %714 = vmatpush.bf16.msrb.mxu2 %v1653_v11 }
  0x5b   : > { %501 = vmatmul.bf16.vlgmr.msra.gmra.mxu3 %v2155_v13  ;;  %1040 = vmatpush.bf16.msrb.mxu0 %v1669_v14 }
  0x5d   : > { %601 = vmatpush.bf16.msrb.mxu1 %v1636_v16 }
  0x5e   : > { %878 = vmatpush.bf16.msrb.mxu3 %v1660_v17  ;;  %715 = vmatpush.bf16.msrb.mxu2 %v1652_v18 }
  0x5f   : > { %1041 = vmatpush.bf16.msrb.mxu0 %v1668_v19 }
  0x61   : > { %602 = vmatpush.bf16.msrb.mxu1 %v1635_v20 }
  0x62   : > { %879 = vmatpush.bf16.msrb.mxu3 %v1659_v21  ;;  %716 = vmatpush.bf16.msrb.mxu2 %v1651_v22 }
  0x63   : > { %1042 = vmatpush.bf16.msrb.mxu0 %v1667_v23 }
  0x65   : > { %603 = vmatpush.bf16.msrb.mxu1 %v1634_v24 }
  0x66   : > { %880 = vmatpush.bf16.msrb.mxu3 %v1658_v25  ;;  %717 = vmatpush.bf16.msrb.mxu2 %v1650_v26 }
  0x67   : > { %1043 = vmatpush.bf16.msrb.mxu0 %v1666_v27 }
  0x68   : > { %481 = vmatmul.bf16.gmra.mxu0 %v1623_v30 }
  0x69   : > { %604 = vmatpush.bf16.msrb.mxu1 %v1633_v28  ;;  %496 = vmatmul.bf16.gmra.mxu2 %v1626_v32 }
  0x6a   : > { %881 = vmatpush.bf16.msrb.mxu3 %v1657_v29  ;;  %718 = vmatpush.bf16.msrb.mxu2 %v1649_v31 }
  0x6b   : > { %506 = vmatmul.bf16.gmra.mxu3 %v2167_v33  ;;  %1044 = vmatpush.bf16.msrb.mxu0 %v1665_v34 }
  0x6d   : > { %605 = vmatpush.bf16.msrb.mxu1 %v1632_v35 }
  0x6e   : > { %882 = vmatpush.bf16.msrb.mxu3 %v1656_v36  ;;  %719 = vmatpush.bf16.msrb.mxu2 %v1648_v37 }
  0x6f   : > { %1045 = vmatpush.bf16.msrb.mxu0 %v1664_v38 }
  0x71   : > { %606 = vmatpush.bf16.msrb.mxu1 %v1631_v39 }
  0x72   : > { %883 = vmatpush.bf16.msrb.mxu3 %v1655_v40  ;;  %720 = vmatpush.bf16.msrb.mxu2 %v1647_v41 }
  0x73   : > { %1046 = vmatpush.bf16.msrb.mxu0 %v1663_v42 }
  0x75   : > { %607 = vmatpush.bf16.msrb.mxu1 %v1630_v43 }
  0x76   : > { %884 = vmatpush.bf16.msrb.mxu3 %v1654_v44  ;;  %721 = vmatpush.bf16.msrb.mxu2 %v1646_v45 }
  0x77   : > { %1047 = vmatpush.bf16.msrb.mxu0 %v1662_v46 }
  0x78   : > { %608 = vmatmul.bf16.vlgmr.msrb.gmra.mxu1 %v2149_v10 }
  0x79   : > { %722 = vmatmul.bf16.vlgmr.msrb.gmra.mxu2 %v2149_v10 }
  0x7a   : > { %1048 = vmatmul.bf16.vlgmr.msrb.gmra.mxu0 %v2149_v10 }
  0x7b   : > { %511 = vmatmul.bf16.gmra.mxu3 %v2171_v47 }
  0x88   : > { %613 = vmatmul.bf16.gmra.mxu1 %v1623_v30 }
  0x89   : > { %727 = vmatmul.bf16.gmra.mxu2 %v1623_v30 }
  0x8a   : > { %1053 = vmatmul.bf16.gmra.mxu0 %v1623_v30 }
  0x8b   : > { %885 = vmatmul.bf16.vlgmr.msrb.gmra.mxu3 %v2149_v10 }
  0x98   : > { %618 = vmatmul.bf16.gmra.mxu1 %v2158_v15 }
  0x99   : > { %732 = vmatmul.bf16.gmra.mxu2 %v2158_v15 }
  0x9a   : > { %1058 = vmatmul.bf16.gmra.mxu0 %v2158_v15 }
  0x9b   : > { %890 = vmatmul.bf16.gmra.mxu3 %v1623_v30 }
  0xa8   : > { %623 = vmatmul.bf16.gmra.mxu1 %v2152_v12 }
  0xa9   : > { %737 = vmatmul.bf16.gmra.mxu2 %v2152_v12 }
  0xaa   : > { %1063 = vmatmul.bf16.gmra.mxu0 %v2152_v12 }
  0xab   : > { %895 = vmatmul.bf16.gmra.mxu3 %v2158_v15 }
  0xb8   : > { %628 = vmatmul.bf16.gmra.mxu1 %v1626_v32 }
  0xb9   : > { %742 = vmatmul.bf16.gmra.mxu2 %v1626_v32 }
  0xba   : > { %1068 = vmatmul.bf16.gmra.mxu0 %v1626_v32 }
  0xbb   : > { %900 = vmatmul.bf16.gmra.mxu3 %v2152_v12 }
  0xc8   : > { %633 = vmatmul.bf16.gmra.mxu1 %v2155_v13 }
  0xc9   : > { %747 = vmatmul.bf16.gmra.mxu2 %v2155_v13 }
  0xca   : > { %1073 = vmatmul.bf16.gmra.mxu0 %v2155_v13 }
  0xcb   : > { %905 = vmatmul.bf16.gmra.mxu3 %v1626_v32 }
  0xd5   : > { %v2189_v48 = vpop.f32.mrf.mxu0  ;;  %v487_v49 = vpop.f32.mrf.mxu1 }
  0xd6   : > { %v517_v52 = vrot.slane %v2189_v48, 1  ;;  %v521_v58 = vrot.slane %v487_v49, 1 }
  0xd8   : > { %638 = vmatmul.bf16.gmra.mxu1 %v2167_v33 }
  0xd9   : > { %752 = vmatmul.bf16.gmra.mxu2 %v2167_v33 }
  0xda   : > { %1078 = vmatmul.bf16.gmra.mxu0 %v2167_v33 }
  0xdb   : > { %910 = vmatmul.bf16.gmra.mxu3 %v2155_v13 }
  0xdc   : > { %v492_v53 = vpop.f32.mrf.mxu2 }
  0xdd   : > { %v479_v55 = vpop.f32.mrf.mxu0  ;;  %v523_v56 = vrot.slane %v492_v53, 1  ;;  %v489_v59 = vpop.f32.mrf.mxu1 }
  0xde   : > { %v502_v54 = vpop.f32.mrf.mxu3  ;;  %v518_v57 = vrot.slane %v479_v55, 1  ;;  %v522_v60 = vrot.slane %v489_v59, 1 }
  0xdf   : > { %v527_v2 = vrot.slane %v502_v54, 1 }
  0xe0   : > { %v550_v61 = vsel %vm535_vm0, %v517_v52, %v518_v57  ;;  %v2205_v62 = vsel %vm535_vm0, %v521_v58, %v522_v60  ;;  %v2209_v63 = vsel %vm535_vm0, %v522_v60, %v523_v56 }
  0xe4   : > { %v494_v0 = vpop.f32.mrf.mxu2 }
  0xe5   : > { %v524_v3 = vrot.slane %v494_v0, 1  ;;  %v482_v5 = vpop.f32.mrf.mxu0 }
  0xe6   : > { %v504_v1 = vpop.f32.mrf.mxu3  ;;  %v519_v6 = vrot.slane %v482_v5, 1 }
  0xe7   : > { %v528_v4 = vrot.slane %v504_v1, 1  ;;  %v2214_v7 = vsel %vm535_vm0, %v523_v56, %v524_v3 }
  0xe8   : > { %643 = vmatmul.bf16.gmra.mxu1 %v2171_v47  ;;  %v549_v9 = vsel %vm535_vm0, %v518_v57, %v519_v6 }
  0xe9   : > { %v2218_v8 = vsel %vm535_vm0, %v527_v2, %v528_v4  ;;  %757 = vmatmul.bf16.gmra.mxu2 %v2171_v47 }
  0xea   : > { %1083 = vmatmul.bf16.gmra.mxu0 %v2171_v47 }
  0xeb   : > { %915 = vmatmul.bf16.gmra.mxu3 %v2167_v33 }
  0xec   : > { %v497_v10 = vpop.f32.mrf.mxu2 }
  0xed   : > { %v525_v12 = vrot.slane %v497_v10, 1  ;;  %v484_v14 = vpop.f32.mrf.mxu0  ;;  %v1238_v10 = vld [vmem:[#allocation8 + $0x70] sm:$0xff] }
  0xee   : > { %v507_v11 = vpop.f32.mrf.mxu3  ;;  %v520_v15 = vrot.slane %v484_v14, 1 }
  0xef   : > { %v529_v13 = vrot.slane %v507_v11, 1  ;;  %v2227_v16 = vsel %vm535_vm0, %v524_v3, %v525_v12 }
  0xf0   : > { %v548_v18 = vsel %vm535_vm0, %v519_v6, %v520_v15  ;;  %v547_v19 = vsel %vm535_vm0, %v520_v15, %v521_v58 }
  0xf1   : > { %v2231_v17 = vsel %vm535_vm0, %v528_v4, %v529_v13 }
  0xf4   : > { %v499_v22 = vpop.f32.mrf.mxu2 }
  0xf5   : > { %v609_v20 = vpop.f32.mrf.mxu1  ;;  %v526_v24 = vrot.slane %v499_v22, 1 }
  0xf6   : > { %v610_v21 = vadd.f32 %v609_v20, %v550_v61  ;;  %v509_v23 = vpop.f32.mrf.mxu3 }
  0xf7   : > { %v530_v25 = vrot.slane %v509_v23, 1  ;;  %v2237_v26 = vpop.f32.mrf.mxu0  ;;  %v2241_v27 = vsel %vm535_vm0, %v525_v12, %v526_v24  ;;  %v2245_v28 = vsel %vm535_vm0, %v526_v24, %v527_v2 }
  0xf8   : > { %v1089_v35 = vrot.slane %v2237_v26, 4 }
  0xf9   : > { %v2249_v29 = vsel %vm535_vm0, %v529_v13, %v530_v25 }
  0xfb   : > { %920 = vmatmul.bf16.gmra.mxu3 %v2171_v47 }
  0xfc   : > { %v2252_v33 = vpop.f32.mrf.mxu2 }
  0xfd   : > { %v611_v30 = vpop.f32.mrf.mxu1  ;;  %v763_v40 = vrot.slane %v2252_v33, 2 }
  0xfe   : > { %v612_v31 = vadd.f32 %v611_v30, %v549_v9  ;;  %v512_v32 = vpop.f32.mrf.mxu3  ;;  %v1239_v9 = vld [vmem:[#allocation8 + $0x78] sm:$0xff] }
  0xff   : > { %v531_v34 = vrot.slane %v512_v32, 1  ;;  %v1051_v36 = vpop.f32.mrf.mxu0  ;;  %1274 = vmatpush.msra.mxu1 %v1239_v9 }
 0x100   : > { %v1090_v38 = vrot.slane %v1051_v36, 4 }
 0x101   : > { %v2258_v37 = vsel %vm535_vm0, %v530_v25, %v531_v34  ;;  %1275 = vmatpush.msra.mxu1 %v1238_v10 }
 0x102   : > { %v1120_v39 = vsel %vm1105_vm1, %v1089_v35, %v1090_v38 }
 0x104   : > { %v725_v44 = vpop.f32.mrf.mxu2 }
 0x105   : > { %v614_v41 = vpop.f32.mrf.mxu1  ;;  %v764_v46 = vrot.slane %v725_v44, 2  ;;  %v2306_v44 = vld [vmem:[#allocation7 + $0x8] sm:$0xff] }
 0x106   : > { %v615_v42 = vadd.f32 %v614_v41, %v548_v18  ;;  %v514_v43 = vpop.f32.mrf.mxu3 }
 0x107   : > { %v532_v45 = vrot.slane %v514_v43, 1  ;;  %v794_v47 = vsel %vm779_vm2, %v763_v40, %v764_v46  ;;  %v1054_v49 = vpop.f32.mrf.mxu0  ;;  %v2304_v43 = vld [vmem:[#allocation7] sm:$0xff] }
 0x108   : > { %v796_v54 = vadd.f32 %v794_v47, %v610_v21  ;;  %v1091_v55 = vrot.slane %v1054_v49, 4 }
 0x109   : > { %v2272_v50 = vsel %vm535_vm0, %v531_v34, %v532_v45  ;;  %v2278_v53 = vsel %vm535_vm0, %v532_v45, %v517_v52 }
 0x10a   : > { %v1119_v56 = vsel %vm1105_vm1, %v1090_v38, %v1091_v55 }
 0x10c   : > { %v728_v59 = vpop.f32.mrf.mxu2 }
 0x10d   : > { %v616_v57 = vpop.f32.mrf.mxu1  ;;  %v765_v61 = vrot.slane %v728_v59, 2 }
 0x10e   : > { %v617_v58 = vadd.f32 %v616_v57, %v547_v19  ;;  %v2282_v60 = vpop.f32.mrf.mxu3 }
 0x10f   : > { %v793_v0 = vsel %vm779_vm2, %v764_v46, %v765_v61  ;;  %v1056_v1 = vpop.f32.mrf.mxu0  ;;  %v926_v11 = vrot.slane %v2282_v60, 3 }
 0x110   : > { %v797_v48 = vadd.f32 %v793_v0, %v612_v31  ;;  %v1092_v2 = vrot.slane %v1056_v1, 4  ;;  %v1237_v0 = vld [vmem:[#allocation8 + $0x68] sm:$0xff]  ;;  %v1236_v1 = vld [vmem:[#allocation8 + $0x60] sm:$0xff] }
 0x111   : > { %1276 = vmatpush.msra.mxu1 %v1237_v0 }
 0x112   : > { %v1118_v52 = vsel %vm1105_vm1, %v1091_v55, %v1092_v2 }
 0x113   : > { %1277 = vmatpush.msra.mxu1 %v1236_v1 }
 0x114   : > { %v730_v5 = vpop.f32.mrf.mxu2 }
 0x115   : > { %v619_v3 = vpop.f32.mrf.mxu1  ;;  %v766_v12 = vrot.slane %v730_v5, 2 }
 0x116   : > { %v620_v4 = vadd.f32 %v619_v3, %v2205_v62  ;;  %v888_v6 = vpop.f32.mrf.mxu3 }
 0x117   : > { %v927_v13 = vrot.slane %v888_v6, 3  ;;  %v792_v14 = vsel %vm779_vm2, %v765_v61, %v766_v12  ;;  %v1059_v62 = vpop.f32.mrf.mxu0 }
 0x118   : > { %v798_v18 = vadd.f32 %v792_v14, %v615_v42  ;;  %v1093_v20 = vrot.slane %v1059_v62, 4 }
 0x119   : > { %v957_v15 = vsel %vm942_vm3, %v926_v11, %v927_v13 }
 0x11a   : > { %v959_v19 = vadd.f32 %v957_v15, %v796_v54  ;;  %v1117_v22 = vsel %vm1105_vm1, %v1092_v2, %v1093_v20 }
 0x11c   : > { %v1122_v21 = vadd.f32 %v1120_v39, %v959_v19  ;;  %v733_v25 = vpop.f32.mrf.mxu2 }
 0x11d   : > { %v621_v23 = vpop.f32.mrf.mxu1  ;;  %v767_v31 = vrot.slane %v733_v25, 2  ;;  %v1234_v25 = vld [vmem:[#allocation8 + $0x50] sm:$0xff] }
 0x11e   : > { %v622_v24 = vadd.f32 %v621_v23, %v2209_v63  ;;  %v891_v30 = vpop.f32.mrf.mxu3  ;;  %v1140_v47 = vadd.f32 %v2304_v43, %v1122_v21  ;;  %v1235_v23 = vld [vmem:[#allocation8 + $0x58] sm:$0xff] }
 0x11f   : > { %v928_v32 = vrot.slane %v891_v30, 3  ;;  %v791_v34 = vsel %vm779_vm2, %v766_v12, %v767_v31  ;;  %v1061_v38 = vpop.f32.mrf.mxu0  ;;  %1278 = vmatpush.msra.mxu1 %v1235_v23 }
 0x120   : > { %v799_v41 = vadd.f32 %v791_v34, %v617_v58  ;;  %v1094_v39 = vrot.slane %v1061_v38, 4 }
 0x121   : > { %v956_v36 = vsel %vm942_vm3, %v927_v13, %v928_v32  ;;  %1279 = vmatpush.msra.mxu1 %v1234_v25 }
 0x122   : > { %v960_v42 = vadd.f32 %v956_v36, %v797_v48  ;;  %v1116_v63 = vsel %vm1105_vm1, %v1093_v20, %v1094_v39 }
 0x124   : > { %v1123_v45 = vadd.f32 %v1119_v56, %v960_v42  ;;  %v735_v55 = vpop.f32.mrf.mxu2 }
 0x125   : > { %v624_v46 = vpop.f32.mrf.mxu1  ;;  %v768_v58 = vrot.slane %v735_v55, 2 }
 0x126   : > { %v1141_v49 = vadd.f32 %v2306_v44, %v1123_v45  ;;  %v625_v54 = vadd.f32 %v624_v46, %v2214_v7  ;;  %v893_v57 = vpop.f32.mrf.mxu3 }
 0x127   : > { %v929_v59 = vrot.slane %v893_v57, 3  ;;  %v790_v56 = vsel %vm779_vm2, %v767_v31, %v768_v58  ;;  %v2317_v2 = vpop.f32.mrf.mxu0 }
 0x128   : > { %v1156_v61 = vmax.f32 %v1140_v47, %v1141_v49  ;;  %v800_v3 = vadd.f32 %v790_v56, %v620_v4  ;;  %v1095_v7 = vrot.slane %v2317_v2, 4 }
 0x129   : > { %v955_v48 = vsel %vm942_vm3, %v928_v32, %v929_v59 }
 0x12a   : > { %v961_v5 = vadd.f32 %v955_v48, %v798_v18  ;;  %v1115_v9 = vsel %vm1105_vm1, %v1094_v39, %v1095_v7  ;;  %v1157_v62 = vrot.slane %v1156_v61, 4 }
 0x12c   : > { %v1124_v6 = vadd.f32 %v1118_v52, %v961_v5  ;;  %v738_v12 = vpop.f32.mrf.mxu2  ;;  %v1158_v30 = vmax.f32 %v1156_v61, %v1157_v62  ;;  %v1232_v62 = vld [vmem:[#allocation8 + $0x40] sm:$0xff] }
 0x12d   : > { %v2324_v10 = vpop.f32.mrf.mxu1  ;;  %v769_v14 = vrot.slane %v738_v12, 2 }
 0x12e   : > { %v896_v13 = vpop.f32.mrf.mxu3  ;;  %v1142_v32 = vadd.f32 %v2304_v43, %v1124_v6 }
 0x12f   : > { %v930_v15 = vrot.slane %v896_v13, 3  ;;  %v789_v4 = vsel %vm779_vm2, %v768_v58, %v769_v14  ;;  %v2330_v20 = vpop.f32.mrf.mxu0 }
 0x130   : > { %v801_v19 = vadd.f32 %v789_v4, %v622_v24 }
 0x131   : > { %v954_v18 = vsel %vm942_vm3, %v929_v59, %v930_v15 }
 0x132   : > { %v962_v52 = vadd.f32 %v954_v18, %v799_v41  ;;  %v1159_v41 = vrot.slane %v1158_v30, 2 }
 0x134   : > { %v1125_v21 = vadd.f32 %v1117_v22, %v962_v52  ;;  %v740_v36 = vpop.f32.mrf.mxu2  ;;  %v1160_v58 = vmax.f32 %v1158_v30, %v1159_v41  ;;  %v1096_v30 = vrot.slane %v2330_v20, 4 }
 0x135   : > { %v2332_v31 = vpop.f32.mrf.mxu1  ;;  %v770_v42 = vrot.slane %v740_v36, 2 }
 0x136   : > { %v1143_v34 = vadd.f32 %v2306_v44, %v1125_v21  ;;  %v898_v38 = vpop.f32.mrf.mxu3  ;;  %v1161_v6 = vrot.slane %v1160_v58, 1  ;;  %v1114_v20 = vsel %vm1105_vm1, %v1095_v7, %v1096_v30 }
 0x137   : > { %v931_v39 = vrot.slane %v898_v38, 3  ;;  %v788_v22 = vsel %vm779_vm2, %v769_v14, %v770_v42  ;;  %v2340_v59 = vpop.f32.mrf.mxu0 }
 0x138   : > { %v1163_v24 = vmax.f32 %v1142_v32, %v1143_v34  ;;  %v802_v47 = vadd.f32 %v788_v22, %v625_v54  ;;  %v1162_v4 = vmax.f32 %v1160_v58, %v1161_v6  ;;  %v627_v58 = vadd.f32 %v2324_v10, %v2227_v16 }
 0x139   : > { %v953_v45 = vsel %vm942_vm3, %v930_v15, %v931_v39  ;;  %v1233_v15 = vld [vmem:[#allocation8 + $0x48] sm:$0xff]  ;;  %v1097_v2 = vrot.slane %v2340_v59, 4 }
 0x13a   : > { %v1164_v46 = vrot.slane %v1163_v24, 4  ;;  %v963_v49 = vadd.f32 %v953_v45, %v800_v3  ;;  %1280 = vmatpush.msra.mxu1 %v1233_v15 }
 0x13b   : > { %v1113_v16 = vsel %vm1105_vm1, %v1096_v30, %v1097_v2 }
 0x13c   : > { %v1165_v55 = vmax.f32 %v1163_v24, %v1164_v46  ;;  %v1126_v57 = vadd.f32 %v1116_v63, %v963_v49  ;;  %v2344_v1 = vpop.f32.mrf.mxu2  ;;  %v2351_v63 = vld [vmem:[%s2536_s3] ss:$0 sm:$0xff]  ;;  %1281 = vmatpush.msra.mxu1 %v1232_v62 }
 0x13d   : > { %v2342_v61 = vpop.f32.mrf.mxu1  ;;  %v1216_v38 = vadd.f32 %v2351_v63, %v1162_v4 }
 0x13e   : > { %v1166_v0 = vrot.slane %v1165_v55, 2  ;;  %v901_v56 = vpop.f32.mrf.mxu3  ;;  %v1144_v21 = vadd.f32 %v2304_v43, %v1126_v57 }
 0x13f   : > { %v932_v48 = vrot.slane %v901_v56, 3  ;;  %v2359_v32 = vpop.f32.mrf.mxu0 }
 0x140   : > { %v1167_v5 = vmax.f32 %v1165_v55, %v1166_v0 }
 0x141   : > { %v952_v12 = vsel %vm942_vm3, %v931_v39, %v932_v48  ;;  %v771_v39 = vrot.slane %v2344_v1, 2 }
 0x142   : > { %v1168_v13 = vrot.slane %v1167_v5, 1  ;;  %v964_v54 = vadd.f32 %v952_v12, %v801_v19 }
 0x143   : > { %v787_v55 = vsel %vm779_vm2, %v770_v42, %v771_v39 }
 0x144   : > { %v1169_v3 = vmax.f32 %v1167_v5, %v1168_v13  ;;  %v1127_v14 = vadd.f32 %v1115_v9, %v964_v54  ;;  %v745_v19 = vpop.f32.mrf.mxu2  ;;  %v1231_v13 = vld [vmem:[#allocation8 + $0x38] sm:$0xff]  ;;  %v1230_v54 = vld [vmem:[#allocation8 + $0x30] sm:$0xff] }
 0x145   : > { %v2353_v18 = vpop.f32.mrf.mxu1  ;;  %1282 = vmatpush.msra.mxu1 %v1231_v13 }
 0x146   : > { %v1217_v52 = vadd.f32 %v2351_v63, %v1169_v3  ;;  %v1145_v23 = vadd.f32 %v2306_v44, %v1127_v14  ;;  %v903_v25 = vpop.f32.mrf.mxu3  ;;  %v772_v14 = vrot.slane %v745_v19, 2 }
 0x147   : > { %v933_v34 = vrot.slane %v903_v25, 3  ;;  %v2378_v5 = vpop.f32.mrf.mxu0  ;;  %1283 = vmatpush.msra.mxu1 %v1230_v54 }
 0x148   : > { %v1252_v9 = vrot.slane %v1217_v52, 7  ;;  %v1170_v36 = vmax.f32 %v1144_v21, %v1145_v23  ;;  %v786_v30 = vsel %vm779_vm2, %v771_v39, %v772_v14  ;;  %v632_v39 = vadd.f32 %v2342_v61, %v2245_v28 }
 0x149   : > { %v951_v24 = vsel %vm942_vm3, %v932_v48, %v933_v34  ;;  %v803_v48 = vadd.f32 %v787_v55, %v627_v58 }
 0x14a   : > { %v1171_v41 = vrot.slane %v1170_v36, 4  ;;  %v965_v22 = vadd.f32 %v951_v24, %v802_v47  ;;  %v1254_v45 = vsel %vm1253_vm4, %v1252_v9, %v1216_v38  ;;  %v630_v9 = vadd.f32 %v2332_v31, %v2241_v27 }
 0x14c   : > { %v1172_v46 = vmax.f32 %v1170_v36, %v1171_v41  ;;  %v1128_v49 = vadd.f32 %v1114_v20, %v965_v22  ;;  %v2375_v1 = vpop.f32.mrf.mxu2  ;;  %v804_v22 = vadd.f32 %v786_v30, %v630_v9 }
 0x14d   : > { %v2371_v57 = vpop.f32.mrf.mxu1  ;;  %v773_v19 = vrot.slane %v2375_v1, 2 }
 0x14e   : > { %v1173_v0 = vrot.slane %v1172_v46, 2  ;;  %v906_v47 = vpop.f32.mrf.mxu3  ;;  %v1146_v59 = vadd.f32 %v2304_v43, %v1128_v49 }
 0x14f   : > { %v934_v56 = vrot.slane %v906_v47, 3  ;;  %v2396_v38 = vpop.f32.mrf.mxu0  ;;  %v785_v49 = vsel %vm779_vm2, %v772_v14, %v773_v19 }
 0x150   : > { %v1174_v7 = vmax.f32 %v1172_v46, %v1173_v0  ;;  %v1098_v46 = vrot.slane %v2359_v32, 4  ;;  %v1099_v0 = vrot.slane %v2378_v5, 4  ;;  %v805_v47 = vadd.f32 %v785_v49, %v632_v39 }
 0x151   : > { %v950_v6 = vsel %vm942_vm3, %v933_v34, %v934_v56 }
 0x152   : > { %v1175_v42 = vrot.slane %v1174_v7, 1  ;;  %v966_v12 = vadd.f32 %v950_v6, %v803_v48  ;;  %v1228_v48 = vld [vmem:[#allocation8 + $0x20] sm:$0xff]  ;;  %v1112_v32 = vsel %vm1105_vm1, %v1097_v2, %v1098_v46  ;;  %v1111_v5 = vsel %vm1105_vm1, %v1098_v46, %v1099_v0 }
 0x154   : > { %v1176_v10 = vmax.f32 %v1174_v7, %v1175_v42  ;;  %v1129_v3 = vadd.f32 %v1113_v16, %v966_v12  ;;  %v2386_v62 = vpop.f32.mrf.mxu2 }
 0x155   : > { %v2389_v21 = vpop.f32.mrf.mxu1  ;;  %v774_v54 = vrot.slane %v2386_v62, 2 }
 0x156   : > { %v1147_v15 = vadd.f32 %v2306_v44, %v1129_v3  ;;  %v908_v4 = vpop.f32.mrf.mxu3  ;;  %v1218_v52 = vadd.f32 %v2351_v63, %v1176_v10 }
 0x157   : > { %v935_v23 = vrot.slane %v908_v4, 3  ;;  %v2417_v16 = vpop.f32.mrf.mxu0 }
 0x158   : > { %v1177_v25 = vmax.f32 %v1146_v59, %v1147_v15  ;;  %v1255_v34 = vrot.slane %v1218_v52, 6 }
 0x159   : > { %v949_v24 = vsel %vm942_vm3, %v934_v56, %v935_v23  ;;  %v1229_v56 = vld [vmem:[#allocation8 + $0x28] sm:$0xff] }
 0x15a   : > { %v1178_v36 = vrot.slane %v1177_v25, 4  ;;  %v1257_v41 = vsel %vm1256_vm5, %v1255_v34, %v1254_v45  ;;  %v967_v58 = vadd.f32 %v949_v24, %v804_v22  ;;  %1284 = vmatpush.msra.mxu1 %v1229_v56 }
 0x15c   : > { %v1179_v20 = vmax.f32 %v1177_v25, %v1178_v36  ;;  %v2405_v27 = vpop.f32.mrf.mxu2  ;;  %v1130_v6 = vadd.f32 %v1112_v32, %v967_v58  ;;  %1285 = vmatpush.msra.mxu1 %v1228_v48  ;;  %v635_v25 = vadd.f32 %v2353_v18, %v2218_v8  ;;  %v1101_v58 = vrot.slane %v2417_v16, 4  ;;  %v1226_v32 = vld [vmem:[#allocation8 + $0x10] sm:$0xff] }
 0x15d   : > { %v2410_v7 = vpop.f32.mrf.mxu1  ;;  %v775_v62 = vrot.slane %v2405_v27, 2 }
 0x15e   : > { %v1180_v55 = vrot.slane %v1179_v20, 2  ;;  %v911_v31 = vpop.f32.mrf.mxu3  ;;  %v1148_v2 = vadd.f32 %v2304_v43, %v1130_v6 }
 0x15f   : > { %v936_v1 = vrot.slane %v911_v31, 3  ;;  %v783_v46 = vsel %vm779_vm2, %v774_v54, %v775_v62 }
 0x160   : > { %v1181_v45 = vmax.f32 %v1179_v20, %v1180_v55  ;;  %v1100_v20 = vrot.slane %v2396_v38, 4  ;;  %v1227_v55 = vld [vmem:[#allocation8 + $0x18] sm:$0xff] }
 0x161   : > { %v948_v28 = vsel %vm942_vm3, %v935_v23, %v936_v1  ;;  %v784_v23 = vsel %vm779_vm2, %v773_v19, %v774_v54  ;;  %v637_v19 = vadd.f32 %v2371_v57, %v2231_v17  ;;  %1286 = vmatpush.msra.mxu1 %v1227_v55  ;;  %v1224_v54 = vld [vmem:[#allocation8] sm:$0xff] }
 0x162   : > { %v1182_v61 = vrot.slane %v1181_v45, 1  ;;  %v968_v42 = vadd.f32 %v948_v28, %v805_v47  ;;  %v806_v24 = vadd.f32 %v784_v23, %v635_v25  ;;  %v1110_v38 = vsel %vm1105_vm1, %v1099_v0, %v1100_v20  ;;  %v1225_v28 = vld [vmem:[#allocation8 + $0x8] sm:$0xff] }
 0x163   : > { %v1109_v56 = vsel %vm1105_vm1, %v1100_v20, %v1101_v58  ;;  %1287 = vmatpush.msra.mxu1 %v1226_v32  ;;  %v640_v23 = vadd.f32 %v2389_v21, %v2249_v29 }
 0x164   : > { %v1183_v12 = vmax.f32 %v1181_v45, %v1182_v61  ;;  %v1131_v13 = vadd.f32 %v1111_v5, %v968_v42  ;;  %v2421_v3 = vpop.f32.mrf.mxu2 }
 0x165   : > { %v2429_v30 = vpop.f32.mrf.mxu1  ;;  %v776_v6 = vrot.slane %v2421_v3, 2  ;;  %1288 = vmatpush.msra.mxu1 %v1225_v28 }
 0x166   : > { %v1149_v10 = vadd.f32 %v2306_v44, %v1131_v13  ;;  %v913_v14 = vpop.f32.mrf.mxu3  ;;  %v1219_v59 = vadd.f32 %v2351_v63, %v1183_v12 }
 0x167   : > { %v937_v15 = vrot.slane %v913_v14, 3  ;;  %v782_v3 = vsel %vm779_vm2, %v775_v62, %v776_v6  ;;  %1289 = vmatpush.msra.mxu1 %v1224_v54 }
 0x168   : > { %v1184_v4 = vmax.f32 %v1148_v2, %v1149_v10  ;;  %v1258_v52 = vrot.slane %v1219_v59, 5 }
 0x169   : > { %v947_v9 = vsel %vm942_vm3, %v936_v1, %v937_v15  ;;  %v1081_v1 = vpop.f32.mrf.mxu0 }
 0x16a   : > { %v1185_v34 = vrot.slane %v1184_v4, 4  ;;  %v1260_v36 = vsel %vm1259_vm6, %v1258_v52, %v1257_v41  ;;  %v969_v39 = vadd.f32 %v947_v9, %v806_v24  ;;  %v807_v41 = vadd.f32 %v783_v46, %v637_v19 }
 0x16b   : > { %v1102_v20 = vrot.slane %v1081_v1, 4 }
 0x16c   : > { %v1186_v22 = vmax.f32 %v1184_v4, %v1185_v34  ;;  %v2438_v8 = vpop.f32.mrf.mxu2  ;;  %v1132_v57 = vadd.f32 %v1110_v38, %v969_v39 }
 0x16d   : > { %v646_v42 = vpop.f32.mrf.mxu1  ;;  %v777_v4 = vrot.slane %v2438_v8, 2 }
 0x16e   : > { %v1187_v49 = vrot.slane %v1186_v22, 2  ;;  %v916_v18 = vpop.f32.mrf.mxu3  ;;  %v1150_v5 = vadd.f32 %v2304_v43, %v1132_v57  ;;  %v647_v14 = vadd.f32 %v646_v42, %v2278_v53 }
 0x16f   : > { %v938_v27 = vrot.slane %v916_v18, 3  ;;  %v781_v33 = vsel %vm779_vm2, %v776_v6, %v777_v4  ;;  %v1108_v18 = vsel %vm1105_vm1, %v1101_v58, %v1102_v20 }
 0x170   : > { %v1188_v31 = vmax.f32 %v1186_v22, %v1187_v49  ;;  %v808_v22 = vadd.f32 %v782_v3, %v640_v23 }
 0x171   : > { %v946_v47 = vsel %vm942_vm3, %v937_v15, %v938_v27  ;;  %v1084_v25 = vpop.f32.mrf.mxu0 }
 0x172   : > { %v1189_v17 = vrot.slane %v1188_v31, 1  ;;  %v970_v45 = vadd.f32 %v946_v47, %v807_v41  ;;  %v1103_v29 = vrot.slane %v1084_v25, 4  ;;  %v645_v47 = vadd.f32 %v2429_v30, %v2272_v50 }
 0x174   : > { %v1133_v48 = vadd.f32 %v1109_v56, %v970_v45  ;;  %v1190_v61 = vmax.f32 %v1188_v31, %v1189_v17  ;;  %v760_v12 = vpop.f32.mrf.mxu2  ;;  %v1107_v31 = vsel %vm1105_vm1, %v1102_v20, %v1103_v29 }
 0x175   : > { %v778_v2 = vrot.slane %v760_v12, 2 }
 0x176   : > { %v1151_v0 = vadd.f32 %v2306_v44, %v1133_v48  ;;  %v918_v13 = vpop.f32.mrf.mxu3  ;;  %v1220_v16 = vadd.f32 %v2351_v63, %v1190_v61 }
 0x177   : > { %v939_v10 = vrot.slane %v918_v13, 3  ;;  %v795_v52 = vsel %vm779_vm2, %v778_v2, %v763_v40  ;;  %v642_v40 = vadd.f32 %v2410_v7, %v2258_v37  ;;  %v780_v38 = vsel %vm779_vm2, %v777_v4, %v778_v2 }
 0x178   : > { %v1191_v59 = vmax.f32 %v1150_v5, %v1151_v0  ;;  %v1261_v15 = vrot.slane %v1220_v16, 4  ;;  %v811_v53 = vadd.f32 %v795_v52, %v647_v14  ;;  %v810_v32 = vadd.f32 %v780_v38, %v645_v47 }
 0x179   : > { %v945_v9 = vsel %vm942_vm3, %v938_v27, %v939_v10  ;;  %v809_v39 = vadd.f32 %v781_v33, %v642_v40  ;;  %v1086_v37 = vpop.f32.mrf.mxu0 }
 0x17a   : > { %v1192_v34 = vrot.slane %v1191_v59, 4  ;;  %v1263_v24 = vsel %vm1262_vm7, %v1261_v15, %v1260_v36  ;;  %v971_v19 = vadd.f32 %v945_v9, %v808_v22  ;;  %v1104_v56 = vrot.slane %v1086_v37, 4 }
 0x17c   : > { %v1193_v62 = vmax.f32 %v1191_v59, %v1192_v34  ;;  %v1134_v55 = vadd.f32 %v1108_v18, %v971_v19  ;;  %v1106_v12 = vsel %vm1105_vm1, %v1103_v29, %v1104_v56  ;;  %v1121_v13 = vsel %vm1105_vm1, %v1104_v56, %v1089_v35 }
 0x17e   : > { %v1194_v46 = vrot.slane %v1193_v62, 2  ;;  %v921_v49 = vpop.f32.mrf.mxu3  ;;  %v1152_v58 = vadd.f32 %v2304_v43, %v1134_v55 }
 0x17f   : > { %v940_v21 = vrot.slane %v921_v49, 3 }
 0x180   : > { %v1195_v8 = vmax.f32 %v1193_v62, %v1194_v46 }
 0x181   : > { %v944_v36 = vsel %vm942_vm3, %v939_v10, %v940_v21 }
 0x182   : > { %v972_v27 = vadd.f32 %v944_v36, %v809_v39  ;;  %v1196_v41 = vrot.slane %v1195_v8, 1 }
 0x184   : > { %v1135_v7 = vadd.f32 %v1107_v31, %v972_v27  ;;  %v1197_v1 = vmax.f32 %v1195_v8, %v1196_v41 }
 0x186   : > { %v1153_v17 = vadd.f32 %v2306_v44, %v1135_v7  ;;  %v923_v57 = vpop.f32.mrf.mxu3  ;;  %v1221_v45 = vadd.f32 %v2351_v63, %v1197_v1 }
 0x187   : > { %v941_v48 = vrot.slane %v923_v57, 3 }
 0x188   : > { %v1198_v28 = vmax.f32 %v1152_v58, %v1153_v17  ;;  %v1264_v61 = vrot.slane %v1221_v45, 3 }
 0x189   : > { %v943_v6 = vsel %vm942_vm3, %v940_v21, %v941_v48  ;;  %v958_v50 = vsel %vm942_vm3, %v941_v48, %v926_v11 }
 0x18a   : > { %v1199_v30 = vrot.slane %v1198_v28, 4  ;;  %v973_v42 = vadd.f32 %v943_v6, %v810_v32  ;;  %v974_v5 = vadd.f32 %v958_v50, %v811_v53  ;;  %v1266_v0 = vsel %vm1265_vm8, %v1264_v61, %v1263_v24  ;;  %v1776_v24 = vld [vmem:[%s2538_s5] ss:$0 sm:$0xff] }
 0x18c   : > { %v1200_v54 = vmax.f32 %v1198_v28, %v1199_v30  ;;  %v1136_v16 = vadd.f32 %v1106_v12, %v973_v42  ;;  %v1137_v2 = vadd.f32 %v1121_v13, %v974_v5 }
 0x18e   : > { %v1201_v10 = vrot.slane %v1200_v54, 2  ;;  %v1154_v60 = vadd.f32 %v2304_v43, %v1136_v16  ;;  %v1155_v11 = vadd.f32 %v2306_v44, %v1137_v2 }
 0x190   : > { %v1205_v14 = vmax.f32 %v1154_v60, %v1155_v11  ;;  %v1202_v59 = vmax.f32 %v1200_v54, %v1201_v10 }
 0x192   : > { %v1206_v15 = vrot.slane %v1205_v14, 4  ;;  %v1203_v3 = vrot.slane %v1202_v59, 1 }
 0x194   : > { %v1207_v4 = vmax.f32 %v1205_v14, %v1206_v15  ;;  %v1204_v52 = vmax.f32 %v1202_v59, %v1203_v3 }
 0x196   : > { %v1208_v26 = vrot.slane %v1207_v4, 2  ;;  %v1222_v51 = vadd.f32 %v2351_v63, %v1204_v52 }
 0x198   : > { %v1209_v35 = vmax.f32 %v1207_v4, %v1208_v26  ;;  %v1267_v23 = vrot.slane %v1222_v51, 2 }
 0x19a   : > { %v1210_v25 = vrot.slane %v1209_v35, 1  ;;  %v1269_v34 = vsel %vm1268_vm9, %v1267_v23, %v1266_v0 }
 0x19c   : > { %v1211_v53 = vmax.f32 %v1209_v35, %v1210_v25 }
 0x19e   : > { %v1223_v43 = vadd.f32 %v2351_v63, %v1211_v53 }
 0x1a0   : > { %v1270_v44 = vrot.slane %v1223_v43, 1 }
 0x1a2   : > { %v1272_v9 = vsel %vm1271_vm10, %v1270_v44, %v1269_v34 }
 0x1a3   : > { %1290 = vmatmul.f32.vlgmr.msra.gmra.mxu1 %v1272_v9 }
 0x220   : > { %v1291_v63 = vpop.f32.mrf.mxu1 }
 0x221   : > { %v1292_v22 = vadd.f32 %v1776_v24, %v1291_v63 }
 0x223   : > { %1294 = vst [vmem:[%s321_s18] sm:$0xff] %v1292_v22 }
 0x224   : > { %1924 = shalt.err (!%p1921_p10)
}
 0x225   : > { %1708 = dma.vmem_to_hbm [thread:$0]  (%p2100_p3), %s1309_s7, 128, %s1311_s15, %s1296_s16  }
 0x226 PF: > { %s1322_s26 = sand.u32 1, %s1959_s21   ;;  %p2550_p12 = scmp.ge.s32.totalorder %s1971_s24, 2 }
 0x227   : > { %s1323_s13 = scalar_lea.sflag [#allocation4], %s1322_s26 }
 0x228   : > { %p1725_p13 = pnand %p2550_p12, %p2050_p6 }
 0x22a   : > { %p1726_p0 = pneg %p1725_p13 }
 0x22c   : > { %1954 = dma.done.wait (%p1726_p0), %s1323_s13, 128  }
 0x22d   : > { %1956 = vsyncadd (%p1726_p0), %s1323_s13, 4294967168  ;;  %p21_p5 = scmp.ge.s32.totalorder %s2087_s10, 4   ;;  %s2551_s21 = smov %s1963_s22 }
 0x22e   : > { %s2552_s22 = smov %s1967_s23  ;;  %s2553_s23 = smov %s2096_s14 }
 0x22f   : > { %s2554_s24 = smov %s2087_s10  ;;  %23 = sbr.rel (!%p21_p5) target bundleno = 7 (0x7), region = 105 }
 0x234   :  { %1329 = vsyncpa [#allocation3], 1 }
 0x235   :  { %1331 = vsyncpa [#allocation3 + $0x1], 1 }
 0x236   :  { %1332 = vsyncpa [#allocation6], 1 }
 0x237   :  { %1333 = vsyncpa [#allocation9], 1 }
 0x238   :  { %1334 = vsyncpa [#allocation4], 1 }
 0x239   :  { %1336 = vsyncpa [#allocation4 + $0x1], 1 }

</bundles_post_ra>
